<compile_context>
chip_gen: v6e
topology: v6e:2x2x1
jax: 0.10.0
libtpu: 0.0.40
codegen_flags: <defaults>
</compile_context>

<pallas_src>
import math
import functools

import jax
import jax.numpy as jnp
from jax import lax
from jax.experimental import pallas as pl
from jax.experimental.pallas import tpu as pltpu


def _norm_rows(v):
    # F.normalize semantics: v / max(||v||_2, 1e-12) == v * rsqrt(max(sum(v*v), 1e-24))
    sq = jnp.sum(v * v, axis=-1, keepdims=True)
    return v * lax.rsqrt(jnp.maximum(sq, 1e-24))


def _cosine_logits(xn, w_ref):
    w = w_ref[...].astype(jnp.float32)
    wn = _norm_rows(w)
    # xn @ wn.T without materializing the transpose: contract dim 1 of both operands.
    return lax.dot_general(
        xn, wn,
        dimension_numbers=(((1,), (1,)), ((), ())),
        preferred_element_type=jnp.float32,
    )


def _sphereface_logits_kernel(xn_ref, w_ref, o_ref):
    # label is None path: plain normalized cosine logits for this C tile.
    xn = xn_ref[...].astype(jnp.float32)
    o_ref[...] = _cosine_logits(xn, w_ref).astype(o_ref.dtype)


def _sphereface_margin_ls0_kernel(xn_ref, w_ref, label_ref, o_ref, *, s, m, tile_c):
    # ls_eps == 0 fast path: transcendentals only on the per-row target logit.
    xn = xn_ref[...].astype(jnp.float32)
    logits = _cosine_logits(xn, w_ref)                              # (B, TILE_C)

    col0 = pl.program_id(0) * tile_c
    col_ids = col0 + lax.broadcasted_iota(jnp.int32, logits.shape, 1)
    is_target = col_ids == label_ref[...]                           # (B, TILE_C) bool

    # Per-row target cosine if it lives in this tile (0.0 otherwise -> phi unused there).
    t = jnp.sum(jnp.where(is_target, logits, 0.0), axis=-1, keepdims=True)
    theta = jnp.arccos(jnp.clip(t, -1.0 + 1e-07, 1.0 - 1e-07))
    phi = jnp.cos(m * theta)                                        # (B, 1)

    out = jnp.where(is_target, phi, logits)
    o_ref[...] = (out * s).astype(o_ref.dtype)


def _sphereface_margin_ls_kernel(xn_ref, w_ref, label_ref, o_ref, *, s, m, ls_eps,
                                 out_features, tile_c):
    # ls_eps > 0: label smoothing mixes phi into every column -> full-tile transcendentals.
    xn = xn_ref[...].astype(jnp.float32)
    logits = _cosine_logits(xn, w_ref)

    theta = jnp.arccos(jnp.clip(logits, -1.0 + 1e-07, 1.0 - 1e-07))
    target_logits = jnp.cos(m * theta)

    col0 = pl.program_id(0) * tile_c
    col_ids = col0 + lax.broadcasted_iota(jnp.int32, logits.shape, 1)
    one_hot = (col_ids == label_ref[...]).astype(jnp.float32)
    one_hot = (1.0 - ls_eps) * one_hot + ls_eps / out_features

    out = logits * (1.0 - one_hot) + target_logits * one_hot
    o_ref[...] = (out * s).astype(o_ref.dtype)


def _choose_tile_c(B, C, D):
    # Keep double-buffered W tile + output tile well inside default scoped VMEM on all of
    # v5e/v6e/v7x (~16 MiB budget), TILE_C a multiple of 128 for lane-dense unmasked stores.
    budget = 16 * 1024 * 1024
    per_col = 4 * (2 * D + 2 * B)        # f32 bytes per class column (W + out, x2 buffers)
    t = budget // max(per_col, 1)
    t = max(128, (t // 128) * 128)
    t = min(t, 8192)
    return C if C <= t else t


def sphereface_forward(x, W, label=None, *, s=30.0, m=1.35, ls_eps=0.0, tile_c=None):
    """Pallas SphereFace forward. x: (B, D), W: (C, D), label: (B,) int32 or None."""
    B, D = x.shape
    C, Dw = W.shape
    assert D == Dw

    x32 = x.astype(jnp.float32)
    xn = _norm_rows(x32)                 # normalize input once; resident across C tiles
    W32 = W.astype(jnp.float32)

    if tile_c is None:
        tile_c = _choose_tile_c(B, C, D)
    grid = (pl.cdiv(C, tile_c),)

    out_shape = jax.ShapeDtypeStruct((B, C), jnp.float32)
    x_spec = pl.BlockSpec((B, D), lambda j: (0, 0))          # resident
    w_spec = pl.BlockSpec((tile_c, D), lambda j: (j, 0))     # streamed, double-buffered
    out_spec = pl.BlockSpec((B, tile_c), lambda j: (0, j))   # lane-dense output tile
    cparams = pltpu.CompilerParams(dimension_semantics=("parallel",))

    if label is None:
        return pl.pallas_call(
            _sphereface_logits_kernel,
            out_shape=out_shape,
            grid=grid,
            in_specs=[x_spec, w_spec],
            out_specs=out_spec,
            compiler_params=cparams,
        )(xn, W32)

    label2d = label.astype(jnp.int32).reshape(B, 1)
    label_spec = pl.BlockSpec((B, 1), lambda j: (0, 0))      # resident

    if ls_eps > 0:
        kernel = functools.partial(
            _sphereface_margin_ls_kernel, s=s, m=m, ls_eps=ls_eps,
            out_features=C, tile_c=tile_c)
    else:
        kernel = functools.partial(
            _sphereface_margin_ls0_kernel, s=s, m=m, tile_c=tile_c)

    return pl.pallas_call(
        kernel,
        out_shape=out_shape,
        grid=grid,
        in_specs=[x_spec, w_spec, label_spec],
        out_specs=out_spec,
        compiler_params=cparams,
    )(xn, W32, label2d)


def xavier_uniform(key, out_features, in_features):
    # matches nn.init.xavier_uniform_ on a (out_features, in_features) weight
    bound = math.sqrt(6.0 / (in_features + out_features))
    return jax.random.uniform(
        key, (out_features, in_features), dtype=jnp.float32, minval=-bound, maxval=bound
    )


def _reference_logits(x, W):
    xn = x / jnp.maximum(jnp.linalg.norm(x, axis=-1, keepdims=True), 1e-12)
    wn = W / jnp.maximum(jnp.linalg.norm(W, axis=-1, keepdims=True), 1e-12)
    return xn @ wn.T


def _reference(x, W, label, s, m, ls_eps):
    logits = _reference_logits(x, W)
    theta = jnp.arccos(jnp.clip(logits, -1.0 + 1e-07, 1.0 - 1e-07))
    target = jnp.cos(m * theta)
    one_hot = jax.nn.one_hot(label, W.shape[0], dtype=jnp.float32)
    if ls_eps > 0:
        one_hot = (1 - ls_eps) * one_hot + ls_eps / W.shape[0]
    return (logits * (1 - one_hot) + target * one_hot) * s


if __name__ == "__main__":
    key = jax.random.PRNGKey(0)
    k_x, k_w, k_l = jax.random.split(key, 3)

    B, in_features, out_features = 8, 32, 256
    s, m = 30.0, 1.35

    x = jax.random.normal(k_x, (B, in_features), dtype=jnp.float32)
    W = xavier_uniform(k_w, out_features, in_features)
    label = jax.random.randint(k_l, (B,), 0, out_features, dtype=jnp.int32)

    # tile_c=128 -> grid=(2,), exercising the C tiling + resident x/label path.
    logits_only = sphereface_forward(x, W, None, s=s, m=m, ls_eps=0.0, tile_c=128)
    jax.block_until_ready(logits_only)
    assert jnp.allclose(logits_only, _reference_logits(x, W), atol=1e-4, rtol=1e-4), \
        "mismatch vs reference (logits-only path)"

    # ls_eps == 0: per-row-target margin fast path.
    out0 = sphereface_forward(x, W, label, s=s, m=m, ls_eps=0.0, tile_c=128)
    jax.block_until_ready(out0)
    assert jnp.allclose(out0, _reference(x, W, label, s, m, 0.0), atol=1e-4, rtol=1e-4), \
        "mismatch vs reference (ls_eps=0 path)"

    # ls_eps > 0: full-tile margin path with label smoothing.
    out_ls = sphereface_forward(x, W, label, s=s, m=m, ls_eps=0.1, tile_c=128)
    jax.block_until_ready(out_ls)
    assert jnp.allclose(out_ls, _reference(x, W, label, s, m, 0.1), atol=1e-4, rtol=1e-4), \
        "mismatch vs reference (ls_eps>0 path)"

    print("KERNEL_OK")
</pallas_src>

<mosaic_0001>
module attributes {stable_mosaic.version = 11 : i64} {
  func.func @_sphereface_logits_kernel(%arg0: i32, %arg1: memref<8x32xf32, #tpu.memory_space<vmem>>, %arg2: memref<128x32xf32, #tpu.memory_space<vmem>>, %arg3: memref<8x128xf32, #tpu.memory_space<vmem>>) attributes {dimension_semantics = [#tpu.dimension_semantics<parallel>], iteration_bounds = array<i64: 2>, scalar_prefetch = 0 : i64, scratch_operands = 0 : i64, tpu.core_type = #tpu.core_type<tc>, window_params = [{pipeline_mode = #tpu.pipeline_mode<synchronous>, transform_indices = @transform_0, window_bounds = array<i64: 8, 32>}, {transform_indices = @transform_1, window_bounds = array<i64: 128, 32>}, {transform_indices = @transform_2, window_bounds = array<i64: 8, 128>}]} {
    %c0 = arith.constant 0 : index
    %c0_0 = arith.constant 0 : index
    %0 = vector.load %arg1[%c0, %c0_0] : memref<8x32xf32, #tpu.memory_space<vmem>>, vector<8x32xf32>
    %c0_1 = arith.constant 0 : index
    %c0_2 = arith.constant 0 : index
    %1 = vector.load %arg2[%c0_1, %c0_2] : memref<128x32xf32, #tpu.memory_space<vmem>>, vector<128x32xf32>
    %2 = arith.mulf %1, %1 : vector<128x32xf32>
    %cst = arith.constant dense<0.000000e+00> : vector<128xf32>
    %3 = vector.multi_reduction <add>, %2, %cst [1] : vector<128x32xf32> to vector<128xf32>
    %4 = vector.shape_cast %3 : vector<128xf32> to vector<128x1xf32>
    %cst_3 = arith.constant 1.000000e-24 : f32
    %5 = vector.broadcast %cst_3 : f32 to vector<128x1xf32>
    %6 = arith.maximumf %4, %5 : vector<128x1xf32>
    %7 = math.rsqrt %6 : vector<128x1xf32>
    %8 = vector.broadcast %7 : vector<128x1xf32> to vector<128x32xf32>
    %9 = arith.mulf %1, %8 : vector<128x32xf32>
    %cst_4 = arith.constant dense<0.000000e+00> : vector<8x128xf32>
    %10 = tpu.matmul %0, %9, %cst_4 {dimension_numbers = #tpu.dot_dimension_numbers<[1], [1], [0], [0], [0, 0, 1, 0], [], []>} : vector<8x32xf32>, vector<128x32xf32>, vector<8x128xf32> -> vector<8x128xf32>
    %c0_5 = arith.constant 0 : index
    %c0_6 = arith.constant 0 : index
    %11 = vector.load %arg3[%c0_5, %c0_6] : memref<8x128xf32, #tpu.memory_space<vmem>>, vector<8x128xf32>
    tpu.vector_store %arg3[%c0_5, %c0_6], %10 {strides = array<i32>} : memref<8x128xf32, #tpu.memory_space<vmem>>, vector<8x128xf32>,
    return
  }
  func.func @transform_0(%arg0: i32) -> (i32, i32) {
    %c0_i32 = arith.constant 0 : i32
    %c0_i32_0 = arith.constant 0 : i32
    %c0_i32_1 = arith.constant 0 : i32
    return %c0_i32, %c0_i32_0 : i32, i32
  }
  func.func @transform_1(%arg0: i32) -> (i32, i32) {
    %c0_i32 = arith.constant 0 : i32
    %c0_i32_0 = arith.constant 0 : i32
    return %arg0, %c0_i32 : i32, i32
  }
  func.func @transform_2(%arg0: i32) -> (i32, i32) {
    %c0_i32 = arith.constant 0 : i32
    %c0_i32_0 = arith.constant 0 : i32
    return %c0_i32, %arg0 : i32, i32
  }
}

</mosaic_0001>

<bundles_post_ra>
// kernel: tpu_custom_call.1
= control target key start
LH: loop header
LB: loop body
LE: loop exit
PB: predicated region body
PF: predicated region fallthrough
CT: control target
= control target key end

     0   :  { %7 = vsyncpa [#allocation3], 0  ;;  %s951_s0 = inlined_call_operand.vmem [shape: f32[8,32], index: 0, kind: input, shape index: {}]   ;;  %s952_s1 = inlined_call_operand.vmem [shape: f32[256,32], index: 1, kind: input, shape index: {}]   ;;  %s953_s2 = inlined_call_operand.hbm [shape: f32[8,256], index: 2, kind: output, shape index: {}]  }
   0x1   :  { %9 = vsyncpa [#allocation3 + $0x1], 0  ;;  %s702_s9 = smov 0   ;;  %s704_s10 = smov 0  }
   0x2   :  { %s706_s11 = smov 0   ;;  %s708_s12 = smov 0  }
   0x3 LB: > { %s723_s13 = sadd.s32 4294967295, %s682_s12   ;;  %s469_s14 = sadd.s32 4294967294, %s682_s12   ;;  %s682_s12 = sphi %s708_s12, %s959_s12   ;;  %s678_s11 = sphi %s706_s11, %s958_s11   ;;  %s674_s10 = sphi %s704_s10, %s957_s10   ;;  %s670_s9 = sphi %s702_s9, %s956_s9  }
   0x4   : > { %s727_s15 = sadd.s32 1, %s682_s12   ;;  %s69_s16 = sadd.s32 1, %s678_s11 }
   0x5   : > { %s66_s17 = ssub.s32 %s682_s12, %s727_s15  ;;  %p79_p0 = scmp.ne.s32.totalorder %s678_s11, %s674_s10 }
   0x6   : > { %p67_p1 = scmp.eq.s32.totalorder %s66_s17, 0  ;;  %p80_p2 = scmp.eq.s32.totalorder %s723_s13, 1 }
   0x7   : > { %p85_p3 = scmp.ne.s32.totalorder %s674_s10, %s670_s9  ;;  %p86_p4 = scmp.eq.s32.totalorder %s469_s14, 1 }
   0x8   : > { %s738_s18 = scalar_select %p67_p1, %s678_s11, %s69_s16  }
   0x9   : > { %p740_p5 = por %p80_p2, %p79_p0  ;;  %p744_p6 = por %p86_p4, %p85_p3 }
   0xa   : > { %p472_p7 = scmp.ge.s32.totalorder %s682_s12, 1  ;;  %p116_p8 = scmp.lt.s32.totalorder %s682_s12, 3 }
   0xc   : > { %p117_p9 = pnand %p472_p7, %p116_p8 }
   0xd   : > { %s474_s21 = sshll.u32 (!%p117_p9), %s723_s13, 4  ;;  %s135_s28 = sand.u32 (!%p117_p9), 1, %s674_s10  }
   0xe   : > { %120 = sbr.rel (%p117_p9) target bundleno = 452 (0x1c4), region = 28  ;;  %p139_p10 = scmp.lt.s32.totalorder (!%p117_p9), %s474_s21, 31 }
   0xf   : > { %s473_s29 = sshll.u32 (!%p117_p9), %s135_s28, 3  ;;  %s494_s4 = sshll.u32 (!%p117_p9), %s723_s13, 7 }
  0x10   : > { %s137_s30 = scalar_lea.vmem (!%p117_p9), [#allocation2], %s473_s29  ;;  %s912_s7 = scalar_lea.hbm (!%p117_p9), %s953_s2, %s494_s4 }
  0x11   : > { %s410_s3 = sshll.u32 (!%p117_p9), %s137_s30, 4  ;;  %s397_s8 = scalar_lea.sflag (!%p117_p9), [#allocation3], %s135_s28  ;;  %s907_s3 = int_to_ptr.vmem [resolvable:$true] %s410_s3 }
  0x12   : > { %s622_s14 = scalar_lea.vmem (!%p117_p9), %s907_s3, 128  ;;  %s686_s13 = smov (!%p117_p9), [#allocation2]  }
  0x13   : > { %s961_s21 = smov (!%p139_p10, %s474_s21), 31  ;;  %vm177_vm0 = vcmask 261120   ;;  %v684_v46 = vmov 0.0   ;;  %vm685_vm1 = vmmov 0   ;;  %p623_p11 = scmp.ne.s32.totalorder %s907_s3, %s622_s14 }
  0x14   : > { %s475_s22 = sshll.u32 %s961_s21, 3  ;;  %514 = vmatprep.subr.mxu0 %v684_v46  ;;  %546 = vmatprep.mubr.msk.f32.mxu0 %vm685_vm1, %v684_v46  ;;  %s626_s16 = sshll.u32 %s686_s13, 4  ;;  %s627_s16 = int_to_ptr.vmem [resolvable:$false] %s626_s16 }
  0x15   : > { %s754_s25 = scalar_lea.vmem %s952_s1, %s475_s22  ;;  %p624_p12 = pnand %p623_p11, %p740_p5 }
  0x16   : > { %v757_v0 = vld [vmem:[%s754_s25 + $0x78] sm:$0xff]  ;;  %v760_v1 = vld [vmem:[%s754_s25 + $0x70] sm:$0xff]  ;;  %v763_v2 = vld [vmem:[%s754_s25 + $0x68] sm:$0xff]  ;;  %s628_s17 = scalar_lea.vmem %s627_s16, 256  ;;  %p629_p0 = scmp.lt.s32.totalorder %s907_s3, %s627_s16 }
  0x17   : > { %v176_v3 = vmul.f32 %v757_v0, %v757_v0  ;;  %v175_v4 = vmul.f32 %v760_v1, %v760_v1  ;;  %v174_v5 = vmul.f32 %v763_v2, %v763_v2  ;;  %v772_v6 = vld [vmem:[%s754_s25 + $0x60] sm:$0xff]  ;;  %v777_v8 = vld [vmem:[%s754_s25 + $0x58] sm:$0xff]  ;;  %v780_v9 = vld [vmem:[%s754_s25 + $0x50] sm:$0xff]  ;;  %p625_p13 = pneg %p624_p12  ;;  %p630_p1 = scmp.lt.s32.totalorder %s628_s17, %s622_s14 }
  0x18   : > { %v173_v7 = vmul.f32 %v772_v6, %v772_v6  ;;  %v172_v14 = vmul.f32 %v777_v8, %v777_v8  ;;  %v171_v15 = vmul.f32 %v780_v9, %v780_v9  ;;  %v791_v16 = vld [vmem:[%s754_s25 + $0x48] sm:$0xff]  ;;  %v794_v17 = vld [vmem:[%s754_s25 + $0x40] sm:$0xff]  ;;  %v803_v22 = vld [vmem:[%s754_s25 + $0x38] sm:$0xff] }
  0x19   : > { %v223_v10 = vsel %vm177_vm0, %v176_v3, 0.0  ;;  %v217_v11 = vsel %vm177_vm0, %v174_v5, 0.0  ;;  %v220_v12 = vsel %vm177_vm0, %v175_v4, 0.0  ;;  %v170_v20 = vmul.f32 %v791_v16, %v791_v16  ;;  %v806_v23 = vld [vmem:[%s754_s25 + $0x30] sm:$0xff]  ;;  %v815_v28 = vld [vmem:[%s754_s25 + $0x28] sm:$0xff]  ;;  %v818_v29 = vld [vmem:[%s754_s25 + $0x20] sm:$0xff]  ;;  %p631_p2 = por %p630_p1, %p629_p0 }
  0x1a   : > { %224 = vadd.xlane.f32.xlu0 %v223_v10  ;;  %218 = vadd.xlane.f32.xlu1 %v217_v11  ;;  %v214_v13 = vsel %vm177_vm0, %v173_v7, 0.0  ;;  %v211_v18 = vsel %vm177_vm0, %v172_v14, 0.0  ;;  %v208_v19 = vsel %vm177_vm0, %v171_v15, 0.0  ;;  %v169_v21 = vmul.f32 %v794_v17, %v794_v17  ;;  %v827_v34 = vld [vmem:[%s754_s25 + $0x18] sm:$0xff]  ;;  %v830_v35 = vld [vmem:[%s754_s25 + $0x10] sm:$0xff]  ;;  %v839_v40 = vld [vmem:[%s754_s25 + $0x8] sm:$0xff] }
  0x1b   : > { %v205_v24 = vsel %vm177_vm0, %v170_v20, 0.0  ;;  %v168_v26 = vmul.f32 %v803_v22, %v803_v22  ;;  %v167_v27 = vmul.f32 %v806_v23, %v806_v23  ;;  %v166_v32 = vmul.f32 %v815_v28, %v815_v28  ;;  %v842_v41 = vld [vmem:[%s754_s25] sm:$0xff]  ;;  %p632_p3 = pnand %p631_p2, %p625_p13 }
  0x1c   : > { %v202_v25 = vsel %vm177_vm0, %v169_v21, 0.0  ;;  %v165_v33 = vmul.f32 %v818_v29, %v818_v29  ;;  %v164_v38 = vmul.f32 %v827_v34, %v827_v34  ;;  %v163_v39 = vmul.f32 %v830_v35, %v830_v35 }
  0x1d   : > { %v199_v30 = vsel %vm177_vm0, %v168_v26, 0.0  ;;  %v196_v31 = vsel %vm177_vm0, %v167_v27, 0.0  ;;  %v193_v36 = vsel %vm177_vm0, %v166_v32, 0.0  ;;  %v162_v44 = vmul.f32 %v839_v40, %v839_v40 }
  0x1e   : > { %221 = vadd.xlane.f32.xlu0 %v220_v12  ;;  %215 = vadd.xlane.f32.xlu1 %v214_v13  ;;  %v190_v37 = vsel %vm177_vm0, %v165_v33, 0.0  ;;  %v187_v42 = vsel %vm177_vm0, %v164_v38, 0.0  ;;  %v184_v43 = vsel %vm177_vm0, %v163_v39, 0.0  ;;  %v161_v45 = vmul.f32 %v842_v41, %v842_v41 }
  0x1f   : > { %v181_v47 = vsel %vm177_vm0, %v162_v44, 0.0 }
  0x20   : > { %v178_v48 = vsel %vm177_vm0, %v161_v45, 0.0 }
  0x22   : > { %212 = vadd.xlane.f32.xlu0 %v211_v18  ;;  %209 = vadd.xlane.f32.xlu1 %v208_v19 }
  0x26   : > { %206 = vadd.xlane.f32.xlu0 %v205_v24  ;;  %203 = vadd.xlane.f32.xlu1 %v202_v25 }
  0x2a   : > { %200 = vadd.xlane.f32.xlu0 %v199_v30  ;;  %197 = vadd.xlane.f32.xlu1 %v196_v31 }
  0x2e   : > { %194 = vadd.xlane.f32.xlu0 %v193_v36  ;;  %191 = vadd.xlane.f32.xlu1 %v190_v37 }
  0x32   : > { %188 = vadd.xlane.f32.xlu0 %v187_v42  ;;  %185 = vadd.xlane.f32.xlu1 %v184_v43 }
  0x36   : > { %182 = vadd.xlane.f32.xlu0 %v181_v47  ;;  %179 = vadd.xlane.f32.xlu1 %v178_v48 }
  0xa3   : > { %v225_v49 = vpop.xlane.xlu0 %224  ;;  %v219_v50 = vpop.xlane.xlu1 %218 }
  0xa4   : > { %v241_v51 = vmax.f32 %v225_v49, 1e-24  ;;  %v239_v52 = vmax.f32 %v219_v50, 1e-24 }
  0xa6   : > { %590 = vrsqrt.f32 %v241_v51 }
  0xa7   : > { %v222_v53 = vpop.xlane.xlu0 %221  ;;  %v216_v54 = vpop.xlane.xlu1 %215  ;;  %592 = vrsqrt.f32 %v239_v52 }
  0xa8   : > { %v240_v55 = vmax.f32 %v222_v53, 1e-24  ;;  %v238_v56 = vmax.f32 %v216_v54, 1e-24 }
  0xaa   : > { %594 = vrsqrt.f32 %v240_v55 }
  0xab   : > { %v213_v57 = vpop.xlane.xlu0 %212  ;;  %596 = vrsqrt.f32 %v238_v56  ;;  %v210_v59 = vpop.xlane.xlu1 %209 }
  0xac   : > { %v237_v58 = vmax.f32 %v213_v57, 1e-24  ;;  %v236_v60 = vmax.f32 %v210_v59, 1e-24 }
  0xae   : > { %598 = vrsqrt.f32 %v237_v58 }
  0xaf   : > { %v207_v62 = vpop.xlane.xlu0 %206  ;;  %600 = vrsqrt.f32 %v236_v60  ;;  %v204_v7 = vpop.xlane.xlu1 %203 }
  0xb0   : > { %v235_v4 = vmax.f32 %v207_v62, 1e-24  ;;  %v234_v12 = vmax.f32 %v204_v7, 1e-24 }
  0xb2   : > { %602 = vrsqrt.f32 %v235_v4 }
  0xb3   : > { %v591_v61 = vpop.eup %590  ;;  %604 = vrsqrt.f32 %v234_v12 }
  0xb4   : > { %v273_v63 = vmul.f32 %v591_v61, %v757_v0  ;;  %v593_v3 = vpop.eup %592  ;;  %v201_v0 = vpop.xlane.xlu0 %200 }
  0xb5   : > { %v271_v11 = vmul.f32 %v593_v3, %v763_v2  ;;  %v233_v15 = vmax.f32 %v201_v0, 1e-24 }
  0xb6   : > { %515 = vmatpush3.xpose.msk.msra.mxu0 %vm177_vm0, %v273_v63 }
  0xb7   : > { %v595_v5 = vpop.eup %594  ;;  %516 = vmatprep.subr.mxu0 %v684_v46  ;;  %606 = vrsqrt.f32 %v233_v15 }
  0xb8   : > { %v272_v10 = vmul.f32 %v595_v5, %v760_v1  ;;  %v597_v13 = vpop.eup %596  ;;  %v198_v1 = vpop.xlane.xlu1 %197 }
  0xb9   : > { %v270_v14 = vmul.f32 %v597_v13, %v772_v6  ;;  %v232_v19 = vmax.f32 %v198_v1, 1e-24  ;;  %v195_v21 = vpop.xlane.xlu0 %194 }
  0xba   : > { %517 = vmatpush3.xpose.msk.msra.mxu0 %vm177_vm0, %v272_v10  ;;  %v231_v24 = vmax.f32 %v195_v21, 1e-24 }
  0xbb   : > { %518 = vmatprep.subr.mxu0 %v684_v46  ;;  %v599_v18 = vpop.eup %598  ;;  %608 = vrsqrt.f32 %v232_v19 }
  0xbc   : > { %v269_v2 = vmul.f32 %v599_v18, %v777_v8  ;;  %v601_v20 = vpop.eup %600  ;;  %v192_v26 = vpop.xlane.xlu1 %191  ;;  %610 = vrsqrt.f32 %v231_v24 }
  0xbd   : > { %v268_v6 = vmul.f32 %v601_v20, %v780_v9  ;;  %v230_v27 = vmax.f32 %v192_v26, 1e-24  ;;  %v189_v31 = vpop.xlane.xlu0 %188 }
  0xbe   : > { %519 = vmatpush3.xpose.msk.msra.mxu0 %vm177_vm0, %v271_v11  ;;  %v229_v32 = vmax.f32 %v189_v31, 1e-24 }
  0xbf   : > { %520 = vmatprep.subr.mxu0 %v684_v46  ;;  %v603_v25 = vpop.eup %602  ;;  %612 = vrsqrt.f32 %v230_v27 }
  0xc0   : > { %v267_v8 = vmul.f32 %v603_v25, %v791_v16  ;;  %v605_v30 = vpop.eup %604  ;;  %v186_v36 = vpop.xlane.xlu1 %185  ;;  %614 = vrsqrt.f32 %v229_v32 }
  0xc1   : > { %v266_v9 = vmul.f32 %v605_v30, %v794_v17  ;;  %v228_v37 = vmax.f32 %v186_v36, 1e-24  ;;  %v183_v39 = vpop.xlane.xlu0 %182 }
  0xc2   : > { %521 = vmatpush3.xpose.msk.msra.mxu0 %vm177_vm0, %v270_v14  ;;  %v227_v42 = vmax.f32 %v183_v39, 1e-24 }
  0xc3   : > { %522 = vmatprep.subr.mxu0 %v684_v46  ;;  %616 = vrsqrt.f32 %v228_v37 }
  0xc4   : > { %v607_v33 = vpop.eup %606  ;;  %v180_v44 = vpop.xlane.xlu1 %179  ;;  %618 = vrsqrt.f32 %v227_v42 }
  0xc5   : > { %v265_v16 = vmul.f32 %v607_v33, %v803_v22  ;;  %v226_v45 = vmax.f32 %v180_v44, 1e-24 }
  0xc6   : > { %523 = vmatpush3.xpose.msk.msra.mxu0 %vm177_vm0, %v269_v2 }
  0xc7   : > { %524 = vmatprep.subr.mxu0 %v684_v46  ;;  %620 = vrsqrt.f32 %v226_v45 }
  0xc8   : > { %v609_v38 = vpop.eup %608 }
  0xc9   : > { %v264_v17 = vmul.f32 %v609_v38, %v806_v23  ;;  %v611_v43 = vpop.eup %610 }
  0xca   : > { %525 = vmatpush3.xpose.msk.msra.mxu0 %vm177_vm0, %v268_v6  ;;  %v263_v22 = vmul.f32 %v611_v43, %v815_v28 }
  0xcb   : > { %526 = vmatprep.subr.mxu0 %v684_v46 }
  0xcc   : > { %v613_v47 = vpop.eup %612 }
  0xcd   : > { %v262_v48 = vmul.f32 %v613_v47, %v818_v29  ;;  %v615_v23 = vpop.eup %614 }
  0xce   : > { %527 = vmatpush3.xpose.msk.msra.mxu0 %vm177_vm0, %v267_v8  ;;  %v261_v49 = vmul.f32 %v615_v23, %v827_v34 }
  0xcf   : > { %528 = vmatprep.subr.mxu0 %v684_v46 }
  0xd0   : > { %v617_v50 = vpop.eup %616 }
  0xd1   : > { %v260_v28 = vmul.f32 %v617_v50, %v830_v35  ;;  %v619_v51 = vpop.eup %618  ;;  %v144_v35 = vld [vmem:[%s951_s0] sm:$0xff] }
  0xd2   : > { %529 = vmatpush3.xpose.msk.msra.mxu0 %vm177_vm0, %v266_v9  ;;  %v259_v29 = vmul.f32 %v619_v51, %v839_v40 }
  0xd3   : > { %530 = vmatprep.subr.mxu0 %v684_v46 }
  0xd4   : > { %v621_v52 = vpop.eup %620 }
  0xd5   : > { %v258_v34 = vmul.f32 %v621_v52, %v842_v41 }
  0xd6   : > { %531 = vmatpush3.xpose.msk.msra.mxu0 %vm177_vm0, %v265_v16 }
  0xd7   : > { %532 = vmatprep.subr.mxu0 %v684_v46 }
  0xda   : > { %533 = vmatpush3.xpose.msk.msra.mxu0 %vm177_vm0, %v264_v17 }
  0xdb   : > { %534 = vmatprep.subr.mxu0 %v684_v46 }
  0xde   : > { %535 = vmatpush3.xpose.msk.msra.mxu0 %vm177_vm0, %v263_v22 }
  0xdf   : > { %536 = vmatprep.subr.mxu0 %v684_v46 }
  0xe2   : > { %537 = vmatpush3.xpose.msk.msra.mxu0 %vm177_vm0, %v262_v48 }
  0xe3   : > { %538 = vmatprep.subr.mxu0 %v684_v46 }
  0xe6   : > { %539 = vmatpush3.xpose.msk.msra.mxu0 %vm177_vm0, %v261_v49 }
  0xe7   : > { %540 = vmatprep.subr.mxu0 %v684_v46 }
  0xea   : > { %541 = vmatpush3.xpose.msk.msra.mxu0 %vm177_vm0, %v260_v28 }
  0xeb   : > { %542 = vmatprep.subr.mxu0 %v684_v46 }
  0xee   : > { %543 = vmatpush3.xpose.msk.msra.mxu0 %vm177_vm0, %v259_v29 }
  0xef   : > { %544 = vmatprep.subr.mxu0 %v684_v46 }
  0xf2   : > { %545 = vmatpush3.xpose.msk.msra.mxu0 %vm177_vm0, %v258_v34 }
  0xf5   : > { %547 = vmatmul.mubr.msk.f32.vlgmr.msra.gmra.mxu0 %vm177_vm0, %v144_v35 }
 0x1b5   : > { %v391_v40 = vpop.f32.mrf.mxu0 }
 0x1b6   : > { %395 = vst [vmem:[%s137_s30] sm:$0xff] %v391_v40 }
 0x1b7   : > { %v548_v41 = vpop.f32.mrf.mxu0 }
 0x1b8   : > { %635 = shalt.err (!%p632_p3)
}
 0x1b9   : > { %s636_s21 = scalar_lea.hbm %s912_s7, 128  ;;  %s640_s24 = scalar_lea.hbm %s953_s2, 256 }
 0x1ba   : > { %p637_p4 = scmp.ne.s32.totalorder %s912_s7, %s636_s21  ;;  %p641_p9 = scmp.lt.s32.totalorder %s912_s7, %s953_s2 }
 0x1bb   : > { %p642_p10 = scmp.lt.s32.totalorder %s640_s24, %s636_s21 }
 0x1bc   : > { %p638_p7 = pnand %p637_p4, %p740_p5 }
 0x1bd   : > { %p643_p11 = por %p642_p10, %p641_p9 }
 0x1be   : > { %p639_p8 = pneg %p638_p7 }
 0x1c0   : > { %p644_p12 = pnand %p643_p11, %p639_p8 }
 0x1c2   : > { %647 = shalt.err (!%p644_p12)
}
 0x1c3   : > { %549 = dma.vmem_to_hbm [thread:$0]  (%p740_p5), %s907_s3, 128, %s912_s7, %s397_s8  }
 0x1c4 PF: > { %p555_p13 = scmp.ge.s32.totalorder %s682_s12, 2  ;;  %s422_s27 = sand.u32 1, %s670_s9  }
 0x1c5   : > { %s423_s28 = scalar_lea.sflag [#allocation3], %s422_s27 }
 0x1c6   : > { %p552_p0 = pnand %p555_p13, %p744_p6 }
 0x1c8   : > { %p553_p1 = pneg %p552_p0 }
 0x1ca   : > { %665 = dma.done.wait (%p553_p1), %s423_s28, 128  }
 0x1cb   : > { %667 = vsyncadd (%p553_p1), %s423_s28, 4294967168  ;;  %p12_p2 = scmp.ge.s32.totalorder %s727_s15, 4   ;;  %s956_s9 = smov %s674_s10 }
 0x1cc   : > { %s957_s10 = smov %s678_s11  ;;  %s958_s11 = smov %s738_s18 }
 0x1cd   : > { %s959_s12 = smov %s727_s15  ;;  %14 = sbr.rel (!%p12_p2) target bundleno = 3 (0x3), region = 63 }
 0x1d2   :  { %428 = vsyncpa [#allocation3], 1 }
 0x1d3   :  { %430 = vsyncpa [#allocation3 + $0x1], 1 }

</bundles_post_ra>
